<compile_context>
chip_gen: v7x
topology: tpu7x:2x2x1
jax: 0.10.0
libtpu: 0.0.40
codegen_flags: <defaults>
</compile_context>

<pallas_src>
import functools

import numpy as np
import jax
import jax.numpy as jnp
from jax import lax
from jax.experimental import pallas as pl
from jax.experimental.pallas import tpu as pltpu

NEG_FILL = -1000000000.0      # masked_fill value in the torch module
LANE_BLOCK = 512              # lane-dense block width (4 x 128 lanes)
MIN_ELEMS = LANE_BLOCK * 8    # smallest padded stream: one (8, 512) tile
MAX_BLOCK_ROWS = 512          # rows per grid step (512 x 512 f32 = 1 MiB per stream)


def _next_pow2(x: int) -> int:
    return 1 if x <= 1 else 1 << (x - 1).bit_length()


def _listwise_kernel(inv_tau_ref, s_ref, rank_ref, out_ref):
    """Closed-form per-element contribution + fused in-kernel row reduction.

    inv_tau_ref: (1, 1)        f32  SMEM  -- 1 / tau
    s_ref:       (block_r, C)  f32  VMEM  -- predictions sorted by (group, -label)
    rank_ref:    (block_r, C)  i32  VMEM  -- within-group rank (0-based), -1 = padding
    out_ref:     (block_r, 1)  f32  VMEM  -- per-row partial loss sums
    """
    inv_tau = inv_tau_ref[0, 0]
    rank = rank_ref[...]
    valid = rank >= 0
    s_scaled = s_ref[...] * inv_tau
    # Row `rank` of the reference n x n logits holds (rank+1) copies of s/tau and
    # (n-1-rank) copies of NEG_FILL; its logsumexp is s/tau + log(rank+1).  The masked
    # exp() tail underflows to exactly 0 in f32 (as inside torch.logsumexp after max
    # subtraction), so no exp() is emitted -- one log per element is the only EUP op.
    k = (jnp.maximum(rank, 0) + 1).astype(jnp.float32)
    lse = s_scaled + jnp.log(k)
    contrib = lse - s_scaled                      # == -log_probs.diagonal()
    contrib = jnp.where(valid, contrib, 0.0)
    out_ref[...] = jnp.sum(contrib, axis=1, keepdims=True)   # XLU row reduction


@functools.partial(jax.jit, static_argnames=("reduction",))
def _listwise_loss_impl(y_pred, y_true, group_ids, valid, inv_tau, *, reduction):
    b_pad = y_pred.shape[0]

    # ---- device-side packing: composite-key stable sort + within-group ranks ----
    # Keys, most-significant first: valid-elements-first, group_id asc, y_true desc.
    # (Three stable argsorts applied least-significant-first == lexsort.)
    invalid = jnp.logical_not(valid).astype(jnp.int32)
    order = jnp.argsort(-y_true, stable=True)
    order = order[jnp.argsort(group_ids[order], stable=True)]
    order = order[jnp.argsort(invalid[order], stable=True)]

    s_sorted = y_pred[order]
    gid_sorted = group_ids[order]
    valid_sorted = valid[order]

    idx = jnp.arange(b_pad, dtype=jnp.int32)
    is_start = jnp.concatenate(
        [jnp.ones((1,), dtype=jnp.bool_), gid_sorted[1:] != gid_sorted[:-1]])
    start = lax.cummax(jnp.where(is_start, idx, 0), axis=0)
    rank = jnp.where(valid_sorted, idx - start, -1).astype(jnp.int32)
    num_groups = jnp.sum(jnp.logical_and(is_start, valid_sorted).astype(jnp.int32))

    # ---- lane-dense 2D layout + bounded-block Pallas reduction ----
    cols = LANE_BLOCK
    rows = b_pad // cols                      # b_pad is a pow-2 multiple of cols
    block_r = min(MAX_BLOCK_ROWS, rows)       # rows, block_r: powers of two -> divides
    num_tiles = rows // block_r

    s2d = s_sorted.reshape(rows, cols)
    rank2d = rank.reshape(rows, cols)

    row_sums = pl.pallas_call(
        _listwise_kernel,
        out_shape=jax.ShapeDtypeStruct((rows, 1), jnp.float32),
        grid=(num_tiles,),
        in_specs=[
            pl.BlockSpec(memory_space=pltpu.MemorySpace.SMEM),   # 1/tau scalar
            pl.BlockSpec((block_r, cols), lambda t: (t, 0)),     # sorted scores
            pl.BlockSpec((block_r, cols), lambda t: (t, 0)),     # within-group ranks
        ],
        out_specs=pl.BlockSpec((block_r, 1), lambda t: (t, 0)),
        compiler_params=pltpu.CompilerParams(
            dimension_semantics=("parallel",),   # v7x: shard tiles across both TCs
            vmem_limit_bytes=32 * 1024 * 1024,   # ~4-5 MiB needed; safe on v5e/v6e/v7x
        ),
    )(inv_tau, s2d, rank2d)

    total = jnp.sum(row_sums)                    # tiny: rows * 4 bytes
    if reduction == "mean":
        return total / num_groups.astype(jnp.float32)
    return total


def listwise_regression_loss(y_pred, y_true, group_ids, tau=1.0, reduction="mean"):
    """Forward pass equivalent of ListwiseRegressionLoss.forward (Pallas TPU)."""
    yp = jnp.asarray(y_pred, dtype=jnp.float32).reshape(-1)
    yt = jnp.asarray(y_true, dtype=jnp.float32).reshape(-1)
    gid = jnp.asarray(group_ids, dtype=jnp.int32).reshape(-1)
    b = yp.shape[0]

    # Power-of-two bucket (>= one (8, 512) tile) so the jitted impl recompiles only
    # per bucket, never per exact batch size.  Padded elements carry valid=False and
    # are sorted to the end, so their group-id / label values are irrelevant.
    b_pad = max(_next_pow2(b), MIN_ELEMS)
    pad = b_pad - b
    if pad:
        yp = jnp.pad(yp, (0, pad))
        yt = jnp.pad(yt, (0, pad))
        gid = jnp.pad(gid, (0, pad))
    valid = jnp.arange(b_pad, dtype=jnp.int32) < b
    inv_tau = jnp.full((1, 1), 1.0 / float(tau), dtype=jnp.float32)
    return _listwise_loss_impl(yp, yt, gid, valid, inv_tau, reduction=reduction)


def _reference_numpy(y_pred, y_true, group_ids, tau=1.0, reduction="mean"):
    """Pure numpy re-implementation of the torch forward (N x N form, for validation)."""
    loss = 0.0
    uniq = np.unique(group_ids)
    for g in uniq:
        m = group_ids == g
        s = y_pred[m].astype(np.float32)
        y = y_true[m].astype(np.float32)
        order = np.argsort(-y, kind="stable")
        ss = s[order]
        n = ss.shape[0]
        if n == 0:
            continue
        mask = np.tril(np.ones((n, n), dtype=bool))
        logits = np.where(mask, ss[:, None] / tau, NEG_FILL).astype(np.float32)
        mx = logits.max(axis=1, keepdims=True)
        lse = mx + np.log(np.exp(logits - mx).sum(axis=1, keepdims=True))
        log_probs = logits - lse
        loss += -np.trace(log_probs)
    if reduction == "mean":
        return loss / len(uniq)
    return loss


if __name__ == "__main__":
    key = jax.random.PRNGKey(0)
    k1, k2, k3, k4, k5 = jax.random.split(key, 5)

    # Test 1: batch=8, 2 contiguous groups (sizes 3 and 5), tau=1.0, mean reduction.
    y_pred = jax.random.normal(k1, (8,), dtype=jnp.float32)
    y_true = jax.random.normal(k2, (8,), dtype=jnp.float32)
    group_ids = jnp.array([0, 0, 0, 1, 1, 1, 1, 1], dtype=jnp.int32)
    loss = jax.block_until_ready(
        listwise_regression_loss(y_pred, y_true, group_ids, tau=1.0, reduction="mean"))
    ref = _reference_numpy(np.asarray(y_pred), np.asarray(y_true),
                           np.asarray(group_ids), 1.0, "mean")
    assert np.allclose(np.asarray(loss), ref, rtol=1e-5, atol=1e-5), (np.asarray(loss), ref)

    # Test 2: batch=37, interleaved group ids, tau=0.7, sum reduction (same bucket).
    y_pred2 = jax.random.normal(k3, (37,), dtype=jnp.float32)
    y_true2 = jax.random.normal(k4, (37,), dtype=jnp.float32)
    group_ids2 = jax.random.randint(k5, (37,), 0, 5, dtype=jnp.int32)
    loss2 = jax.block_until_ready(
        listwise_regression_loss(y_pred2, y_true2, group_ids2, tau=0.7, reduction="sum"))
    ref2 = _reference_numpy(np.asarray(y_pred2), np.asarray(y_true2),
                            np.asarray(group_ids2), 0.7, "sum")
    assert np.allclose(np.asarray(loss2), ref2, rtol=1e-5, atol=1e-5), (np.asarray(loss2), ref2)

    print("KERNEL_OK")
</pallas_src>

<mosaic_0001>
module attributes {stable_mosaic.version = 11 : i64} {
  func.func private @main(%arg0: i32) attributes {dimension_semantics = [#tpu.dimension_semantics<core_parallel>], iteration_bounds = array<i64: 2>, tpu.core_type = #tpu.core_type<sc_scalar_subcore>, window_params = []} {
    return
  }
}

module attributes {stable_mosaic.version = 11 : i64} {
  func.func private @main(%arg0: i32) attributes {dimension_semantics = [#tpu.dimension_semantics<core_parallel>], iteration_bounds = array<i64: 2>, tpu.core_type = #tpu.core_type<sc_scalar_subcore>, window_params = []} {
    return
  }
}

module attributes {stable_mosaic.version = 11 : i64} {
  func.func @_listwise_kernel(%arg0: i32, %arg1: memref<1x1xf32, #tpu.memory_space<smem>>, %arg2: memref<8x512xf32, #tpu.memory_space<vmem>>, %arg3: memref<8x512xi32, #tpu.memory_space<vmem>>, %arg4: memref<8x1xf32, #tpu.memory_space<vmem>>) attributes {dimension_semantics = [#tpu.dimension_semantics<parallel>], iteration_bounds = array<i64: 1>, scalar_prefetch = 0 : i64, scratch_operands = 0 : i64, tpu.core_type = #tpu.core_type<tc>, window_params = [{transform_indices = @transform_0, window_bounds = array<i64: 1, 1>}, {transform_indices = @transform_1, window_bounds = array<i64: 8, 512>}, {transform_indices = @transform_2, window_bounds = array<i64: 8, 512>}, {transform_indices = @transform_3, window_bounds = array<i64: 8, 1>}]} {
    %c0 = arith.constant 0 : index
    %c0_0 = arith.constant 0 : index
    %0 = memref.load %arg1[%c0, %c0_0] : memref<1x1xf32, #tpu.memory_space<smem>>
    %c0_1 = arith.constant 0 : index
    %c0_2 = arith.constant 0 : index
    %1 = vector.load %arg3[%c0_1, %c0_2] : memref<8x512xi32, #tpu.memory_space<vmem>>, vector<8x512xi32>
    %c0_i32 = arith.constant 0 : i32
    %2 = vector.broadcast %c0_i32 : i32 to vector<8x512xi32>
    %3 = arith.cmpi sge, %1, %2 : vector<8x512xi32>
    %c0_3 = arith.constant 0 : index
    %c0_4 = arith.constant 0 : index
    %4 = vector.load %arg2[%c0_3, %c0_4] : memref<8x512xf32, #tpu.memory_space<vmem>>, vector<8x512xf32>
    %5 = vector.broadcast %0 : f32 to vector<8x512xf32>
    %6 = arith.mulf %4, %5 : vector<8x512xf32>
    %c0_i32_5 = arith.constant 0 : i32
    %7 = vector.broadcast %c0_i32_5 : i32 to vector<8x512xi32>
    %8 = arith.maxsi %1, %7 : vector<8x512xi32>
    %c1_i32 = arith.constant 1 : i32
    %9 = vector.broadcast %c1_i32 : i32 to vector<8x512xi32>
    %10 = arith.addi %8, %9 : vector<8x512xi32>
    %11 = arith.sitofp %10 : vector<8x512xi32> to vector<8x512xf32>
    %12 = math.log %11 : vector<8x512xf32>
    %13 = arith.addf %6, %12 : vector<8x512xf32>
    %14 = arith.subf %13, %6 : vector<8x512xf32>
    %cst = arith.constant 0.000000e+00 : f32
    %15 = vector.broadcast %cst : f32 to vector<8x512xf32>
    %16 = arith.select %3, %14, %15 : vector<8x512xi1>, vector<8x512xf32>
    %cst_6 = arith.constant dense<0.000000e+00> : vector<8xf32>
    %17 = vector.multi_reduction <add>, %16, %cst_6 [1] : vector<8x512xf32> to vector<8xf32>
    %18 = vector.shape_cast %17 : vector<8xf32> to vector<8x1xf32>
    %c0_7 = arith.constant 0 : index
    %c0_8 = arith.constant 0 : index
    %19 = vector.load %arg4[%c0_7, %c0_8] : memref<8x1xf32, #tpu.memory_space<vmem>>, vector<8x1xf32>
    tpu.vector_store %arg4[%c0_7, %c0_8], %18 {strides = array<i32>} : memref<8x1xf32, #tpu.memory_space<vmem>>, vector<8x1xf32>,
    return
  }
  func.func @transform_0(%arg0: i32) -> (i32, i32) {
    %c0_i32 = arith.constant 0 : i32
    %c0_i32_0 = arith.constant 0 : i32
    %c0_i32_1 = arith.constant 0 : i32
    return %c0_i32, %c0_i32_0 : i32, i32
  }
  func.func @transform_1(%arg0: i32) -> (i32, i32) {
    %c0_i32 = arith.constant 0 : i32
    %c0_i32_0 = arith.constant 0 : i32
    return %arg0, %c0_i32 : i32, i32
  }
  func.func @transform_2(%arg0: i32) -> (i32, i32) {
    %c0_i32 = arith.constant 0 : i32
    %c0_i32_0 = arith.constant 0 : i32
    return %arg0, %c0_i32 : i32, i32
  }
  func.func @transform_3(%arg0: i32) -> (i32, i32) {
    %c0_i32 = arith.constant 0 : i32
    %c0_i32_0 = arith.constant 0 : i32
    return %arg0, %c0_i32 : i32, i32
  }
}

</mosaic_0001>

<bundles_post_ra>
// kernel: neg.1
= control target key start
LH: loop header
LB: loop body
LE: loop exit
PB: predicated region body
PF: predicated region fallthrough
CT: control target
= control target key end

     0   :  { %2 = vsyncpa [#allocation1], 0  ;;  %s71_s6 = smov [#allocation0]   ;;  %s106_s0 = inlined_call_operand.hbm [shape: f32[4096], index: 0, kind: input, shape index: {}]   ;;  %s107_s1 = inlined_call_operand.vmem [shape: f32[4096], index: 1, kind: output, shape index: {}]  }
   0x1   :  { %s7_s7 = sshll.u32 %s71_s6, 4  ;;  %s47_s10 = scalar_lea.hbm %s106_s0, 512  ;;  %s8_s7 = int_to_ptr.vmem [resolvable:$true] %s7_s7 }
   0x2   :  { %p48_p0 = scmp.ne.s32.totalorder %s106_s0, %s47_s10  ;;  %p51_p1 = scmp.lt.u32.totalorder %s47_s10, %s106_s0 }
   0x4   :  { %p53_p2 = pnand %p51_p1, %p48_p0 }
   0x6   :  { %56 = shalt.err (!%p53_p2)
}
   0x7   :  { %s57_s15 = scalar_lea.vmem %s8_s7, 512  ;;  %p62_p4 = scmp.lt.s32.totalorder %s8_s7, %s8_s7 }
   0x8   :  { %p58_p3 = scmp.ne.s32.totalorder %s8_s7, %s57_s15  ;;  %p63_p5 = scmp.lt.s32.totalorder %s57_s15, %s57_s15 }
   0xa   :  { %p64_p6 = por %p63_p5, %p62_p4 }
   0xc   :  { %p65_p7 = pnand %p64_p6, %p58_p3 }
   0xe   :  { %68 = shalt.err (!%p65_p7)
}
   0xf   :  { %10 = dma.hbm_to_vmem [thread:$0]  %s106_s0, 512, %s8_s7, [#allocation1]  }
  0x10   :  { %69 = dma.done.wait [#allocation1], 512  }
  0x11   :  { %70 = vsyncadd [#allocation1], 4294966784  ;;  %v12_v0 = vld [vmem:[#allocation0] sm:$0xff]  ;;  %v19_v1 = vld [vmem:[#allocation0 + $0x8] sm:$0xff] }
  0x12   :  { %v27_v2 = vld [vmem:[#allocation0 + $0x10] sm:$0xff]  ;;  %v15_v3 = vxor.u32 2147483648, %v12_v0  ;;  %v22_v4 = vxor.u32 2147483648, %v19_v1  ;;  %v35_v6 = vld [vmem:[#allocation0 + $0x18] sm:$0xff] }
  0x13   :  { %v30_v5 = vxor.u32 2147483648, %v27_v2  ;;  %v38_v7 = vxor.u32 2147483648, %v35_v6 }
  0x14   :  { %17 = vst [vmem:[%s107_s1] sm:$0xff] %v15_v3  ;;  %43 = vst [vmem:[%s107_s1 + $0x8] sm:$0xff] %v22_v4 }
  0x15   :  { %44 = vst [vmem:[%s107_s1 + $0x10] sm:$0xff] %v30_v5  ;;  %45 = vst [vmem:[%s107_s1 + $0x18] sm:$0xff] %v38_v7 }
  0x16   :  { %42 = vsyncpa [#allocation1], 1 }

// kernel: _listwise_loss_impl.1
= control target key start
LH: loop header
LB: loop body
LE: loop exit
PB: predicated region body
PF: predicated region fallthrough
CT: control target
= control target key end

     0   :  { %vm74_vm8 = vcmask 7168   ;;  %s138_s2 = inlined_call_operand.vmem [shape: s32[8,512], index: 2, kind: input, shape index: {}]   ;;  %s139_s0 = inlined_call_operand.<no memory space> [shape: f32[1,1], index: 0, kind: input, shape index: {}]   ;;  %s140_s1 = inlined_call_operand.vmem [shape: f32[8,512], index: 1, kind: input, shape index: {}]   ;;  %s141_s3 = inlined_call_operand.vmem [shape: f32[8,1], index: 3, kind: output, shape index: {}]  }
   0x1   :  { %v16_v0 = vld [vmem:[%s138_s2] sm:$0xff]  ;;  %v17_v1 = vld [vmem:[%s138_s2 + $0x8] sm:$0xff]  ;;  %v18_v2 = vld [vmem:[%s138_s2 + $0x10] sm:$0xff]  ;;  %v28_v17 = vstv %s139_s0 }
   0x2   :  { %v19_v3 = vld [vmem:[%s138_s2 + $0x18] sm:$0xff]  ;;  %vm33_vm0 = vcmp.gt.s32.totalorder %v16_v0, 0  ;;  %vm35_vm1 = vcmp.gt.s32.totalorder %v17_v1, 0  ;;  %vm37_vm2 = vcmp.gt.s32.totalorder %v18_v2, 0  ;;  %v24_v16 = vld [vmem:[%s140_s1] sm:$0xff]  ;;  %v25_v18 = vld [vmem:[%s140_s1 + $0x8] sm:$0xff] }
   0x3   :  { %v34_v4 = vsel %vm33_vm0, %v16_v0, 0  ;;  %v36_v5 = vsel %vm35_vm1, %v17_v1, 0  ;;  %vm39_vm3 = vcmp.gt.s32.totalorder %v19_v3, 0  ;;  %v38_v7 = vsel %vm37_vm2, %v18_v2, 0  ;;  %v26_v19 = vld [vmem:[%s140_s1 + $0x10] sm:$0xff]  ;;  %v27_v20 = vld [vmem:[%s140_s1 + $0x18] sm:$0xff] }
   0x4   :  { %v41_v6 = vadd.s32 1, %v34_v4  ;;  %v40_v8 = vsel %vm39_vm3, %v19_v3, 0  ;;  %v42_v9 = vadd.s32 1, %v36_v5  ;;  %v43_v10 = vadd.s32 1, %v38_v7 }
   0x5   :  { %v44_v11 = vadd.s32 1, %v40_v8  ;;  %v29_v21 = vmul.f32 %v28_v17, %v24_v16  ;;  %v30_v23 = vmul.f32 %v28_v17, %v25_v18  ;;  %v31_v25 = vmul.f32 %v28_v17, %v26_v19 }
   0x6   :  { %v45_v12 = vcvt.s32.f32 %v41_v6  ;;  %v46_v13 = vcvt.s32.f32 %v42_v9  ;;  %v47_v14 = vcvt.s32.f32 %v43_v10  ;;  %v32_v28 = vmul.f32 %v28_v17, %v27_v20 }
   0x7   :  { %v48_v15 = vcvt.s32.f32 %v44_v11  ;;  %vm20_vm4 = vcmp.ge.s32.totalorder %v16_v0, 0  ;;  %vm21_vm5 = vcmp.ge.s32.totalorder %v17_v1, 0  ;;  %vm22_vm6 = vcmp.ge.s32.totalorder %v18_v2, 0 }
   0x8   :  { %80 = vlog2.f32 %v45_v12  ;;  %vm23_vm7 = vcmp.ge.s32.totalorder %v19_v3, 0 }
   0x9   :  { %82 = vlog2.f32 %v46_v13 }
   0xa   :  { %84 = vlog2.f32 %v47_v14 }
   0xb   :  { %86 = vlog2.f32 %v48_v15 }
  0x12   :  { %v81_v22 = vpop.eup %80 }
  0x13   :  { %v83_v24 = vpop.eup %82  ;;  %v50_v26 = vmul.f32 0.6931472, %v81_v22 }
  0x14   :  { %v85_v27 = vpop.eup %84  ;;  %v52_v29 = vmul.f32 0.6931472, %v83_v24 }
  0x15   :  { %v87_v30 = vpop.eup %86  ;;  %v54_v31 = vmul.f32 0.6931472, %v85_v27  ;;  %v57_v32 = vadd.f32 %v50_v26, %v29_v21 }
  0x16   :  { %v56_v33 = vmul.f32 0.6931472, %v87_v30  ;;  %v58_v34 = vadd.f32 %v52_v29, %v30_v23 }
  0x17   :  { %v59_v35 = vadd.f32 %v54_v31, %v31_v25  ;;  %v61_v36 = vsub.f32 %v57_v32, %v29_v21 }
  0x18   :  { %v60_v37 = vadd.f32 %v56_v33, %v32_v28  ;;  %v62_v38 = vsub.f32 %v58_v34, %v30_v23 }
  0x19   :  { %v63_v39 = vsub.f32 %v59_v35, %v31_v25  ;;  %v65_v40 = vsel %vm20_vm4, %v61_v36, 0.0 }
  0x1a   :  { %v64_v41 = vsub.f32 %v60_v37, %v32_v28  ;;  %v66_v42 = vsel %vm21_vm5, %v62_v38, 0.0 }
  0x1b   :  { %v67_v43 = vsel %vm22_vm6, %v63_v39, 0.0  ;;  %v69_v44 = vadd.f32 %v66_v42, %v65_v40 }
  0x1c   :  { %v68_v45 = vsel %vm23_vm7, %v64_v41, 0.0 }
  0x1d   :  { %v70_v46 = vadd.f32 %v69_v44, %v67_v43 }
  0x1f   :  { %v71_v47 = vadd.f32 %v70_v46, %v68_v45 }
  0x21   :  { %72 = vadd.xlane.f32.xlu0 %v71_v47 }
  0xae   :  { %v73_v48 = vpop.xlane.xlu0 %72 }
  0xaf   :  { %75 = vst.msk [vmem:[%s141_s3] sm:$0xff] %vm74_vm8, %v73_v48 }

</bundles_post_ra>
